<compile_context>
chip_gen: v7x
topology: tpu7x:2x2x1
jax: 0.10.0
libtpu: 0.0.40
codegen_flags: <defaults>
</compile_context>

<pallas_src>
import functools

import jax
import jax.numpy as jnp
from jax import lax
from jax.experimental import pallas as pl
from jax.experimental.pallas import tpu as pltpu


# --------------------------- composed-conv weights ------------------------- #
def _compose_weights(params, p):
    """Fold conv3x3(s1,pad1) + conv pxp(stride p) into one (p+2)^2/stride-p conv."""
    w1 = params["w1"].astype(jnp.float32)           # (3, 3, C, E)  HWIO
    w2 = params["w2"].astype(jnp.float32)           # (p, p, E, E)  HWIO
    b1 = params["b1"].astype(jnp.float32)           # (E,)
    b2 = params["b2"].astype(jnp.float32)           # (E,)
    C, E = w1.shape[2], w1.shape[3]

    # t[dh,dw,kh,kw,c,f] = sum_e w1[dh,dw,c,e] * w2[kh,kw,e,f]
    t = jnp.einsum("abce,klef->abklcf", w1, w2,
                   precision=lax.Precision.HIGHEST)
    w_eff = jnp.zeros((p + 2, p + 2, C, E), jnp.float32)
    for dh in range(3):
        for dw in range(3):
            w_eff = w_eff.at[dh:dh + p, dw:dw + p].add(t[dh, dw])
    b_eff = b2 + jnp.einsum("e,klef->f", b1, w2,
                            precision=lax.Precision.HIGHEST)

    # Zero-extend (p+2)^2 -> (2p)^2 and regroup as 2x2 blocks of p x p taps,
    # K order (gh, gw, lh, lw, c) to match the kernel's im2col column order.
    w_ext = jnp.pad(w_eff, ((0, p - 2), (0, p - 2), (0, 0), (0, 0)))
    w_full = (w_ext.reshape(2, p, 2, p, C, E)
                   .transpose(0, 2, 1, 3, 4, 5)
                   .reshape(4 * p * p * C, E))
    return w_full, b_eff


def _pick_band(oH, oW, target_m=256, max_m=2048):
    """Token-rows per band q (divisor of oH): prefer M = q*oW >= target_m for
    MXU fill, M a multiple of 8 (unmasked stores / valid BlockSpec) unless the
    band covers the whole grid, and M <= max_m to bound per-step VMEM."""
    divs = [d for d in range(1, oH + 1) if oH % d == 0]
    for q in divs:                                   # smallest q that fills MXU
        m = q * oW
        if target_m <= m <= max_m and m % 8 == 0:
            return q
    best = None                                      # else biggest aligned band
    for q in divs:
        m = q * oW
        if m <= max_m and (m % 8 == 0 or q == oH):
            best = q
    return best if best is not None else oH


# --------------------------------- kernel ---------------------------------- #
def _tokens_kernel(x_ref, w_ref, b_ref, o_ref, *, q, oW, Kp, E):
    """One grid step = one batch element x one band of q token rows.

    x_ref : (1, oH+1, oW+1, Kp)  space-to-depth image; block index is constant
                                  over the band axis -> one DMA per batch,
                                  VMEM-resident across bands.
    w_ref : (4*Kp, E)            composed weights, K order (gh, gw, lh, lw, c)
    b_ref : (1, E)      f32      composed bias
    o_ref : (1, q*oW, E) f32     tokens for this band
    """
    i = pl.program_id(1)
    # Band of token rows [i*q, i*q + q); the composed conv also reads row +1.
    xb = x_ref[0, pl.ds(i * q, q + 1)]                  # (q+1, oW+1, Kp)

    # im2col entirely in VMEM: the zero-extended (2p)^2 receptive field is the
    # 2x2 neighbourhood of non-overlapping p x p pixel blocks.
    pieces = []
    for gh in range(2):
        for gw in range(2):
            pieces.append(xb[gh:gh + q, gw:gw + oW, :])  # (q, oW, Kp)
    a = jnp.concatenate(pieces, axis=-1)                 # (q, oW, 4*Kp)
    a = a.reshape(q * oW, 4 * Kp)

    # Single MXU matmul (f32 accumulation in the MXU result path); bias after.
    out = jnp.dot(a, w_ref[...], preferred_element_type=jnp.float32)
    out = out + b_ref[...].astype(jnp.float32)
    o_ref[...] = out.reshape(1, q * oW, E).astype(o_ref.dtype)


# ------------------------------ forward wrapper ----------------------------- #
def image_to_tokens(x_nchw, params, patch_size=4, compute_dtype=jnp.bfloat16):
    """Pallas implementation of ImageToTokens.forward.

    Returns (tokens, nH, nW); tokens has shape (B, oH*oW, embed_dim) where
    oH, oW are the padded grid sizes (like PyTorch), while nH, nW are the
    unpadded H//p, W//p (also like PyTorch).
    """
    p = patch_size
    assert p >= 2, "composed-conv path assumes patch_size >= 2"
    B, C, H, W = x_nchw.shape
    E = params["b1"].shape[0]
    nH, nW = H // p, W // p
    pad_h, pad_w = (-H) % p, (-W) % p
    Hp, Wp = H + pad_h, W + pad_w
    oH, oW = Hp // p, Wp // p
    Kp = p * p * C

    # Composed weights (one-time, f32 math, cast to compute dtype).
    w_full, b_eff = _compose_weights(params, p)
    w_full = w_full.astype(compute_dtype)
    b_eff = b_eff.reshape(1, E).astype(jnp.float32)

    # Image prep: 1-px zero border + pad-to-(oH+1)p/(oW+1)p + space-to-depth +
    # cast, all as one fused XLA pass over the (small) input.  The extra zero
    # rows/cols beyond the conv border only ever meet zero taps of w_full.
    xe = jnp.pad(x_nchw, ((0, 0), (0, 0),
                          (1, (oH + 1) * p - 1 - H),
                          (1, (oW + 1) * p - 1 - W)))
    xs2d = (xe.reshape(B, C, oH + 1, p, oW + 1, p)
              .transpose(0, 2, 4, 3, 5, 1)              # (B, R, W, lh, lw, c)
              .reshape(B, oH + 1, oW + 1, Kp)
              .astype(compute_dtype))

    q = _pick_band(oH, oW)
    n_bands = oH // q

    kernel = functools.partial(_tokens_kernel, q=q, oW=oW, Kp=Kp, E=E)

    esize = jnp.dtype(compute_dtype).itemsize
    flops = 2 * B * oH * oW * (4 * Kp) * E
    bytes_accessed = (xs2d.size * esize + w_full.size * esize
                      + b_eff.size * 4 + B * oH * oW * E * 4)
    # Per-step VMEM estimate (double-buffered blocks) -- small now that only
    # the composed (2p)^2*C*E weight (not p^2*E^2) is resident.
    vmem_est = 2 * ((oH + 1) * (oW + 1) * Kp * esize       # image (per batch)
                    + 4 * Kp * E * esize + E * 4           # weights + bias
                    + q * oW * E * 4)                      # output band
    vmem_limit = int(max(2 * vmem_est, 32 * 1024 * 1024))

    tokens = pl.pallas_call(
        kernel,
        out_shape=jax.ShapeDtypeStruct((B, oH * oW, E), jnp.float32),
        grid=(B, n_bands),
        in_specs=[
            # whole s2d image per batch; constant index over the band axis ->
            # fetched once per batch element, reused across all bands
            pl.BlockSpec((1, oH + 1, oW + 1, Kp), lambda b, i: (b, 0, 0, 0)),
            pl.BlockSpec((4 * Kp, E), lambda b, i: (0, 0)),
            pl.BlockSpec((1, E), lambda b, i: (0, 0)),
        ],
        out_specs=pl.BlockSpec((1, q * oW, E), lambda b, i: (b, i, 0)),
        compiler_params=pltpu.CompilerParams(
            # megacore splits on batch so each core keeps its own image
            # resident; the band axis stays a plain sequential loop.
            dimension_semantics=("parallel", "arbitrary"),
            vmem_limit_bytes=vmem_limit),
        cost_estimate=pl.CostEstimate(flops=flops, transcendentals=0,
                                      bytes_accessed=bytes_accessed),
    )(xs2d, w_full, b_eff)

    return tokens, nH, nW


# ---------------------------- pure-JAX reference ---------------------------- #
def _ref_forward(x_nchw, params, patch_size=4):
    """Full-f32 two-conv reference (matches the PyTorch module's math)."""
    p = patch_size
    x = jnp.transpose(x_nchw, (0, 2, 3, 1)).astype(jnp.float32)    # NHWC
    B, H, W, C = x.shape
    pad_h, pad_w = (-H) % p, (-W) % p
    if pad_h or pad_w:
        x = jnp.pad(x, ((0, 0), (0, pad_h), (0, pad_w), (0, 0)))
    y1 = lax.conv_general_dilated(
        x, params["w1"].astype(jnp.float32), (1, 1), ((1, 1), (1, 1)),
        dimension_numbers=("NHWC", "HWIO", "NHWC"),
        precision=lax.Precision.HIGHEST) + params["b1"]
    y2 = lax.conv_general_dilated(
        y1, params["w2"].astype(jnp.float32), (p, p), "VALID",
        dimension_numbers=("NHWC", "HWIO", "NHWC"),
        precision=lax.Precision.HIGHEST) + params["b2"]
    B, oH, oW, E = y2.shape
    return y2.reshape(B, oH * oW, E)


# ----------------------------------- main ----------------------------------- #
if __name__ == "__main__":
    patch_size, in_c, embed_dim = 4, 3, 48
    B, H, W = 2, 16, 16

    key = jax.random.PRNGKey(0)
    k_x, k_w1, k_b1, k_w2, k_b2, k_x2 = jax.random.split(key, 6)

    params = {
        "w1": 0.1 * jax.random.normal(k_w1, (3, 3, in_c, embed_dim), jnp.float32),
        "b1": 0.1 * jax.random.normal(k_b1, (embed_dim,), jnp.float32),
        "w2": 0.05 * jax.random.normal(
            k_w2, (patch_size, patch_size, embed_dim, embed_dim), jnp.float32),
        "b2": 0.1 * jax.random.normal(k_b2, (embed_dim,), jnp.float32),
    }
    x = jax.random.normal(k_x, (B, in_c, H, W), jnp.float32)        # NCHW

    # --- primary run: bf16 MXU path ---
    tokens, nH, nW = image_to_tokens(x, params, patch_size)
    tokens = jax.block_until_ready(tokens)
    assert tokens.shape == (B, (H // patch_size) * (W // patch_size), embed_dim)
    assert (nH, nW) == (H // patch_size, W // patch_size)

    ref = jax.block_until_ready(_ref_forward(x, params, patch_size))
    err_bf16 = float(jnp.max(jnp.abs(tokens - ref)))
    assert jnp.allclose(tokens, ref, atol=3e-2, rtol=3e-2), (
        f"bf16 path mismatch vs f32 conv reference, max abs err = {err_bf16}")

    # --- tight check: f32 compute path vs the f32 two-conv reference ---
    tokens_f32, _, _ = image_to_tokens(x, params, patch_size,
                                       compute_dtype=jnp.float32)
    tokens_f32 = jax.block_until_ready(tokens_f32)
    err_f32 = float(jnp.max(jnp.abs(tokens_f32 - ref)))
    assert jnp.allclose(tokens_f32, ref, atol=5e-3, rtol=5e-3), (
        f"f32 path mismatch vs f32 conv reference, max abs err = {err_f32}")

    # --- H/W not a multiple of patch_size (padding path) ---
    H2, W2 = 18, 10
    x2 = jax.random.normal(k_x2, (B, in_c, H2, W2), jnp.float32)
    tok2, nH2, nW2 = image_to_tokens(x2, params, patch_size,
                                     compute_dtype=jnp.float32)
    tok2 = jax.block_until_ready(tok2)
    ref2 = jax.block_until_ready(_ref_forward(x2, params, patch_size))
    oH2, oW2 = -(-H2 // patch_size), -(-W2 // patch_size)
    assert tok2.shape == (B, oH2 * oW2, embed_dim)
    assert (nH2, nW2) == (H2 // patch_size, W2 // patch_size)
    err_pad = float(jnp.max(jnp.abs(tok2 - ref2)))
    assert jnp.allclose(tok2, ref2, atol=5e-3, rtol=5e-3), (
        f"padded path mismatch, max abs err = {err_pad}")

    print("KERNEL_OK")
</pallas_src>

<mosaic_0001>
module attributes {stable_mosaic.version = 11 : i64} {
  func.func @_tokens_kernel(%arg0: i32, %arg1: i32, %arg2: memref<1x5x5x48xbf16, #tpu.memory_space<vmem>>, %arg3: memref<192x48xbf16, #tpu.memory_space<vmem>>, %arg4: memref<1x48xf32, #tpu.memory_space<vmem>>, %arg5: memref<1x16x48xf32, #tpu.memory_space<vmem>>) attributes {dimension_semantics = [#tpu.dimension_semantics<parallel>, #tpu.dimension_semantics<arbitrary>], iteration_bounds = array<i64: 2, 1>, scalar_prefetch = 0 : i64, scratch_operands = 0 : i64, tpu.core_type = #tpu.core_type<tc>, window_params = [{transform_indices = @transform_0, window_bounds = array<i64: 1, 5, 5, 48>}, {pipeline_mode = #tpu.pipeline_mode<synchronous>, transform_indices = @transform_1, window_bounds = array<i64: 192, 48>}, {pipeline_mode = #tpu.pipeline_mode<synchronous>, transform_indices = @transform_2, window_bounds = array<i64: 1, 48>}, {transform_indices = @transform_3, window_bounds = array<i64: 1, 16, 48>}]} {
    %c4_i32 = arith.constant 4 : i32
    %0 = arith.muli %arg1, %c4_i32 : i32
    %c0 = arith.constant 0 : index
    %1 = arith.index_cast %0 : i32 to index
    %c0_0 = arith.constant 0 : index
    %c0_1 = arith.constant 0 : index
    %2 = vector.load %arg2[%c0, %1, %c0_0, %c0_1] : memref<1x5x5x48xbf16, #tpu.memory_space<vmem>>, vector<1x5x5x48xbf16>
    %3 = vector.shape_cast %2 : vector<1x5x5x48xbf16> to vector<5x5x48xbf16>
    %4 = vector.extract_strided_slice %3 {offsets = [0, 0, 0], sizes = [4, 4, 48], strides = [1, 1, 1]} : vector<5x5x48xbf16> to vector<4x4x48xbf16>
    %5 = vector.extract_strided_slice %3 {offsets = [0, 1, 0], sizes = [4, 4, 48], strides = [1, 1, 1]} : vector<5x5x48xbf16> to vector<4x4x48xbf16>
    %6 = vector.extract_strided_slice %3 {offsets = [1, 0, 0], sizes = [4, 4, 48], strides = [1, 1, 1]} : vector<5x5x48xbf16> to vector<4x4x48xbf16>
    %7 = vector.extract_strided_slice %3 {offsets = [1, 1, 0], sizes = [4, 4, 48], strides = [1, 1, 1]} : vector<5x5x48xbf16> to vector<4x4x48xbf16>
    %8 = tpu.concatenate %4, %5, %6, %7 in 2 : vector<4x4x48xbf16>, vector<4x4x48xbf16>, vector<4x4x48xbf16>, vector<4x4x48xbf16> -> vector<4x4x192xbf16>
    %9 = vector.shape_cast %8 : vector<4x4x192xbf16> to vector<16x192xbf16>
    %c0_2 = arith.constant 0 : index
    %c0_3 = arith.constant 0 : index
    %10 = vector.load %arg3[%c0_2, %c0_3] : memref<192x48xbf16, #tpu.memory_space<vmem>>, vector<192x48xbf16>
    %cst = arith.constant dense<0.000000e+00> : vector<16x48xf32>
    %11 = tpu.matmul %9, %10, %cst {dimension_numbers = #tpu.dot_dimension_numbers<[1], [0], [0], [1], [0, 0, 1, 1], [], []>} : vector<16x192xbf16>, vector<192x48xbf16>, vector<16x48xf32> -> vector<16x48xf32>
    %c0_4 = arith.constant 0 : index
    %c0_5 = arith.constant 0 : index
    %12 = vector.load %arg4[%c0_4, %c0_5] : memref<1x48xf32, #tpu.memory_space<vmem>>, vector<1x48xf32>
    %13 = vector.broadcast %12 : vector<1x48xf32> to vector<16x48xf32>
    %14 = arith.addf %11, %13 : vector<16x48xf32>
    %15 = vector.shape_cast %14 : vector<16x48xf32> to vector<1x16x48xf32>
    %c0_6 = arith.constant 0 : index
    %c0_7 = arith.constant 0 : index
    %c0_8 = arith.constant 0 : index
    %16 = vector.load %arg5[%c0_6, %c0_7, %c0_8] : memref<1x16x48xf32, #tpu.memory_space<vmem>>, vector<1x16x48xf32>
    tpu.vector_store %arg5[%c0_6, %c0_7, %c0_8], %15 {strides = array<i32>} : memref<1x16x48xf32, #tpu.memory_space<vmem>>, vector<1x16x48xf32>,
    return
  }
  func.func @transform_0(%arg0: i32, %arg1: i32) -> (i32, i32, i32, i32) {
    %c0_i32 = arith.constant 0 : i32
    %c0_i32_0 = arith.constant 0 : i32
    %c0_i32_1 = arith.constant 0 : i32
    %c0_i32_2 = arith.constant 0 : i32
    return %arg0, %c0_i32, %c0_i32_0, %c0_i32_1 : i32, i32, i32, i32
  }
  func.func @transform_1(%arg0: i32, %arg1: i32) -> (i32, i32) {
    %c0_i32 = arith.constant 0 : i32
    %c0_i32_0 = arith.constant 0 : i32
    %c0_i32_1 = arith.constant 0 : i32
    return %c0_i32, %c0_i32_0 : i32, i32
  }
  func.func @transform_2(%arg0: i32, %arg1: i32) -> (i32, i32) {
    %c0_i32 = arith.constant 0 : i32
    %c0_i32_0 = arith.constant 0 : i32
    %c0_i32_1 = arith.constant 0 : i32
    return %c0_i32, %c0_i32_0 : i32, i32
  }
  func.func @transform_3(%arg0: i32, %arg1: i32) -> (i32, i32, i32) {
    %c0_i32 = arith.constant 0 : i32
    %c0_i32_0 = arith.constant 0 : i32
    return %arg0, %arg1, %c0_i32 : i32, i32, i32
  }
}

</mosaic_0001>

<bundles_post_ra>
// kernel: tpu_custom_call.1
= control target key start
LH: loop header
LB: loop body
LE: loop exit
PB: predicated region body
PF: predicated region fallthrough
CT: control target
= control target key end

     0   :  { %8 = vsyncpa [#allocation3], 0  ;;  %s1018_s0 = inlined_call_operand.vmem [shape: bf16[2,5,5,48], index: 0, kind: input, shape index: {}]   ;;  %s1019_s1 = inlined_call_operand.vmem [shape: bf16[192,48], index: 1, kind: input, shape index: {}]   ;;  %s1020_s2 = inlined_call_operand.vmem [shape: f32[1,48], index: 2, kind: input, shape index: {}]   ;;  %s1021_s3 = inlined_call_operand.hbm [shape: f32[2,16,48], index: 3, kind: output, shape index: {}]  }
   0x1   :  { %10 = vsyncpa [#allocation3 + $0x1], 0  ;;  %s818_s12 = smov 0   ;;  %s820_s13 = smov 0  }
   0x2   :  { %s822_s14 = smov 0   ;;  %s824_s15 = smov 0  }
   0x3   :  { %s826_s16 = smov 0   ;;  %s828_s17 = smov 0  }
   0x4 LB: > { %s598_s18 = sadd.s32 4294967295, %s788_s17   ;;  %s599_s19 = sadd.s32 4294967294, %s788_s17   ;;  %s788_s17 = sphi %s828_s17, %s16_s17   ;;  %s784_s16 = sphi %s826_s16, %s1028_s16   ;;  %s780_s15 = sphi %s824_s15, %s1027_s15   ;;  %s776_s14 = sphi %s822_s14, %s1026_s14   ;;  %s772_s13 = sphi %s820_s13, %s1025_s13   ;;  %s768_s12 = sphi %s818_s12, %s1024_s12  }
   0x5   : > { %s28_s20 = sadd.s32 1, %s784_s16  ;;  %s105_s21 = sadd.s32 1, %s776_s14 }
   0x6   : > { %p30_p0 = scmp.ge.s32.totalorder %s28_s20, 2  ;;  %p115_p1 = scmp.ne.s32.totalorder %s776_s14, %s772_s13 }
   0x7   : > { %p116_p2 = scmp.eq.s32.totalorder %s598_s18, 1  ;;  %p121_p3 = scmp.ne.s32.totalorder %s772_s13, %s768_s12 }
   0x8   : > { %s1030_s20 = smov (%p30_p0, %s28_s20), 0  ;;  %p122_p5 = scmp.eq.s32.totalorder %s599_s19, 1 }
   0x9   : > { %p858_p4 = por %p116_p2, %p115_p1  ;;  %s100_s23 = ssub.s32 %s784_s16, %s1030_s20 }
   0xa   : > { %p602_p6 = scmp.ge.s32.totalorder %s788_s17, 1  ;;  %p103_p7 = scmp.eq.s32.totalorder %s100_s23, 0 }
   0xb   : > { %p865_p8 = por %p122_p5, %p121_p3  ;;  %p154_p9 = scmp.lt.s32.totalorder %s788_s17, 3 }
   0xc   : > { %s871_s25 = scalar_select %p103_p7, %s776_s14, %s105_s21  }
   0xd   : > { %p155_p10 = pnand %p602_p6, %p154_p9 }
   0xe   : > { %p178_p11 = scmp.lt.s32.totalorder (!%p155_p10), %s780_s15, 1  ;;  %v698_v0 = vld [vmem:[%s1019_s1] sm:$0xff] (!%p155_p10)   ;;  %v790_v1 = vmov (!%p155_p10), 0   ;;  %v699_v2 = vld [vmem:[%s1019_s1 + $0x8] sm:$0xff] (!%p155_p10)   ;;  %v700_v3 = vld [vmem:[%s1019_s1 + $0x10] sm:$0xff] (!%p155_p10)   ;;  %s791_s10 = smov (!%p155_p10), 96   ;;  %v310_v50 = vlaneseq (!%p155_p10) }
   0xf   : > { %158 = sbr.rel (%p155_p10) target bundleno = 408 (0x198), region = 32  ;;  %464 = vmatprep.subr.bf16.mxu0 (!%p155_p10), %v790_v1  ;;  %v701_v17 = vld [vmem:[%s1019_s1 + $0x18] sm:$0xff] (!%p155_p10)   ;;  %v702_v27 = vld [vmem:[%s1019_s1 + $0x20] sm:$0xff] (!%p155_p10)   ;;  %s792_s23 = smov (!%p155_p10), 48   ;;  %v703_v32 = vld [vmem:[%s1019_s1 + $0x28] sm:$0xff] (!%p155_p10)   ;;  %vm267_vm0 = vcmask (!%p155_p10), 392192  }
  0x10   : > { %465 = vmatpush1.bf16.msra.mxu0 (!%p155_p10), %v698_v0  ;;  %v704_v35 = vld [vmem:[%s1019_s1 + $0x30] sm:$0xff] (!%p155_p10)   ;;  %s793_s30 = smov (!%p155_p10), 16   ;;  %v705_v37 = vld [vmem:[%s1019_s1 + $0x38] sm:$0xff] (!%p155_p10)   ;;  %v706_v38 = vld [vmem:[%s1019_s1 + $0x40] sm:$0xff] (!%p155_p10)   ;;  %v794_v48 = vmov (!%p155_p10), 1983009808  }
  0x11   : > { %466 = vmatprep.subr.bf16.mxu0 (!%p155_p10), %v790_v1  ;;  %v707_v39 = vld [vmem:[%s1019_s1 + $0x48] sm:$0xff] (!%p155_p10)   ;;  %v708_v40 = vld [vmem:[%s1019_s1 + $0x50] sm:$0xff] (!%p155_p10)   ;;  %v709_v41 = vld [vmem:[%s1019_s1 + $0x58] sm:$0xff] (!%p155_p10)   ;;  %v308_v49 = vunpack.c.l.s4 (!%p155_p10), %v794_v48  ;;  %v311_v54 = vshrl.u32 (!%p155_p10), %v310_v50, 7  ;;  %vm280_vm1 = vcmask (!%p155_p10), 785408   ;;  %vm289_vm2 = vcmask (!%p155_p10), 130048  }
  0x12   : > { %vm460_vm3 = vcmask (!%p155_p10), 523264   ;;  %s175_s21 = sand.u32 (!%p155_p10), 1, %s772_s13   ;;  %s795_s8 = smov (!%p155_p10), [#allocation2]  }
  0x13   : > { %v309_v53 = vunpack.c.0.s8 (!%p155_p10), %v308_v49  ;;  %s714_s9 = sshll.u32 (!%p155_p10), %s795_s8, 4  ;;  %s715_s9 = int_to_ptr.vmem [resolvable:$false] %s714_s9 }
  0x14   : > { %467 = vmatpush1.bf16.msra.mxu0 (!%p155_p10), %v699_v2 }
  0x15   : > { %468 = vmatprep.subr.bf16.mxu0 (!%p155_p10), %v790_v1  ;;  %v312_v57 = vsub.s32 (!%p155_p10), %v309_v53, %v311_v54 }
  0x16   : > { %s179_s28 = scalar_select %p178_p11, %s780_s15, 1 }
  0x18   : > { %s630_s4 = smul.u32 20, %s179_s28  ;;  %469 = vmatpush1.bf16.msra.mxu0 %v700_v3 }
  0x19   : > { %470 = vmatprep.subr.bf16.mxu0 %v790_v1 }
  0x1a   : > { %s182_s7 = scalar_lea.vmem %s1018_s0, %s630_s4 }
  0x1b   : > { %v889_v4 = vld [vmem:[%s182_s7 + $0x8] sm:$0x7]  ;;  %v891_v5 = vld [vmem:[%s182_s7 + $0x4] sm:$0x7]  ;;  %v898_v9 = vld [vmem:[%s182_s7 + $0xc] sm:$0x7] }
  0x1c   : > { %v607_v6 = vcombine.low %v889_v4, %v889_v4  ;;  %v606_v7 = vcombine.low %v891_v5, %v891_v5  ;;  %v695_v8 = vld [vmem:[%s182_s7 + $0x10] ss:$0 sps:$4 sm:$0x77]   ;;  %v608_v10 = vcombine.low %v898_v9, %v898_v9  ;;  %v902_v11 = vld [vmem:[%s182_s7] sm:$0x7]  ;;  %471 = vmatpush1.bf16.msra.mxu0 %v701_v17 }
  0x1d   : > { %v605_v14 = vcombine.low %v902_v11, %v902_v11  ;;  %472 = vmatprep.subr.bf16.mxu0 %v790_v1  ;;  %v255_v31 = vshll.u32 %v695_v8, 16  ;;  %v253_v33 = vshrl.u32 %v695_v8, 16 }
  0x1e   : > { %246 = vrot.lane.b32.xlu1 %v607_v6, %s791_s10  ;;  %244 = vrot.lane.b32.xlu0 %v606_v7, %s791_s10  ;;  %v220_v12 = vshrl.u32 %v607_v6, 16  ;;  %v222_v13 = vshll.u32 %v607_v6, 16  ;;  %v229_v15 = vshll.u32 %v608_v10, 16  ;;  %v215_v16 = vshll.u32 %v606_v7, 16 }
  0x1f   : > { %v206_v19 = vshrl.u32 %v605_v14, 16  ;;  %v208_v20 = vshll.u32 %v605_v14, 16  ;;  %v227_v21 = vshrl.u32 %v608_v10, 16  ;;  %v213_v23 = vshrl.u32 %v606_v7, 16 }
  0x20   : > { %v224_v18 = vrot.slane %v222_v13, 1  ;;  %v231_v22 = vrot.slane %v229_v15, 1  ;;  %v217_v26 = vrot.slane %v215_v16, 1  ;;  %473 = vmatpush1.bf16.msra.mxu0 %v702_v27  ;;  %v257_v34 = vrot.slane %v255_v31, 1 }
  0x21   : > { %v210_v25 = vrot.slane %v208_v20, 1  ;;  %474 = vmatprep.subr.bf16.mxu0 %v790_v1 }
  0x22   : > { %250 = vrot.lane.b32.xlu1 %v695_v8, %s791_s10  ;;  %248 = vrot.lane.b32.xlu0 %v608_v10, %s791_s10  ;;  %v225_v24 = vor.u32 %v224_v18, %v220_v12  ;;  %v232_v29 = vor.u32 %v231_v22, %v227_v21  ;;  %v218_v30 = vor.u32 %v217_v26, %v213_v23  ;;  %v610_v22 = vld [vmem:[%s1020_s2] ss:$0 sm:$0xff]  ;;  %s716_s10 = scalar_lea.vmem %s715_s9, 512 }
  0x23   : > { %v211_v28 = vor.u32 %v210_v25, %v206_v19  ;;  %v258_v36 = vor.u32 %v257_v34, %v253_v33 }
  0x24   : > { %475 = vmatpush1.bf16.msra.mxu0 %v703_v32 }
  0x25   : > { %476 = vmatprep.subr.bf16.mxu0 %v790_v1 }
  0x26   : > { %237 = vrot.lane.b32.xlu1 %v225_v24, %s792_s23  ;;  %233 = vrot.lane.b32.xlu0 %v211_v28, %s792_s23 }
  0x28   : > { %477 = vmatpush1.bf16.msra.mxu0 %v704_v35 }
  0x29   : > { %478 = vmatprep.subr.bf16.mxu0 %v790_v1 }
  0x2a   : > { %239 = vrot.lane.b32.xlu1 %v232_v29, %s792_s23  ;;  %235 = vrot.lane.b32.xlu0 %v218_v30, %s792_s23  ;;  %s603_s23 = sshll.u32 %s175_s21, 4 }
  0x2b   : > { %s177_s28 = scalar_lea.vmem [#allocation2], %s603_s23 }
  0x2c   : > { %479 = vmatpush1.bf16.msra.mxu0 %v705_v37  ;;  %s523_s29 = sshll.u32 %s177_s28, 4  ;;  %s963_s29 = int_to_ptr.vmem [resolvable:$true] %s523_s29 }
  0x2d   : > { %480 = vmatprep.subr.bf16.mxu0 %v790_v1  ;;  %s710_s7 = scalar_lea.vmem %s963_s29, 256  ;;  %p717_p1 = scmp.lt.s32.totalorder %s963_s29, %s715_s9 }
  0x2e   : > { %261 = vrot.lane.b32.xlu1 %v225_v24, %s793_s30  ;;  %259 = vrot.lane.b32.xlu0 %v218_v30, %s793_s30  ;;  %p711_p12 = scmp.ne.s32.totalorder %s963_s29, %s710_s7  ;;  %p718_p2 = scmp.lt.s32.totalorder %s716_s10, %s710_s7 }
  0x30   : > { %481 = vmatpush1.bf16.msra.mxu0 %v706_v38  ;;  %p712_p13 = pnand %p711_p12, %p858_p4  ;;  %p719_p3 = por %p718_p2, %p717_p1 }
  0x31   : > { %482 = vmatprep.subr.bf16.mxu0 %v790_v1 }
  0x32   : > { %265 = vrot.lane.b32.xlu1 %v258_v36, %s793_s30  ;;  %263 = vrot.lane.b32.xlu0 %v232_v29, %s793_s30  ;;  %s629_s30 = sshll.u32 %s780_s15, 8  ;;  %s972_s15 = scalar_lea.sflag [#allocation3], %s175_s21 }
  0x33   : > { %s968_s6 = scalar_lea.hbm %s1021_s3, %s629_s30  ;;  %p713_p0 = pneg %p712_p13 }
  0x34   : > { %483 = vmatpush1.bf16.msra.mxu0 %v707_v39 }
  0x35   : > { %484 = vmatprep.subr.bf16.mxu0 %v790_v1  ;;  %p720_p5 = pnand %p719_p3, %p713_p0 }
  0x38   : > { %485 = vmatpush1.bf16.msra.mxu0 %v708_v40 }
  0x39   : > { %486 = vmatprep.subr.bf16.mxu0 %v790_v1 }
  0x3c   : > { %487 = vmatpush1.bf16.msra.mxu0 %v709_v41 }
  0x90   : > { %v247_v42 = vpop.permute.xlu1 %246  ;;  %v245_v43 = vpop.permute.xlu0 %244 }
  0x94   : > { %v251_v44 = vpop.permute.xlu1 %250  ;;  %v249_v45 = vpop.permute.xlu0 %248 }
  0x98   : > { %v238_v46 = vpop.permute.xlu1 %237  ;;  %v234_v47 = vpop.permute.xlu0 %233 }
  0x99   : > { %v270_v55 = vsel %vm267_vm0, %v902_v11, %v234_v47  ;;  %v276_v0 = vsel %vm267_vm0, %v889_v4, %v238_v46 }
  0x9a   : > { %v282_v62 = vsel %vm280_vm1, %v270_v55, %v245_v43  ;;  %v286_v12 = vsel %vm280_vm1, %v276_v0, %v249_v45 }
  0x9c   : > { %v240_v51 = vpop.permute.xlu1 %239  ;;  %v236_v52 = vpop.permute.xlu0 %235 }
  0x9d   : > { %v273_v56 = vsel %vm267_vm0, %v891_v5, %v236_v52  ;;  %v279_v1 = vsel %vm267_vm0, %v898_v9, %v240_v51 }
  0x9e   : > { %v284_v60 = vsel %vm280_vm1, %v273_v56, %v247_v42  ;;  %v288_v10 = vsel %vm280_vm1, %v279_v1, %v251_v44 }
  0xa0   : > { %v262_v58 = vpop.permute.xlu1 %261  ;;  %v260_v59 = vpop.permute.xlu0 %259 }
  0xa1   : > { %v293_v61 = vsel %vm289_vm2, %v247_v42, %v262_v58  ;;  %v291_v63 = vsel %vm289_vm2, %v245_v43, %v260_v59 }
  0xa2   : > { %v314_v2 = vcombine.low %v284_v60, %v293_v61  ;;  %v306_v3 = vcombine.low %v282_v62, %v291_v63 }
  0xa4   : > { %v321_v5 = vrot.slane %v314_v2, %v312_v57  ;;  %v313_v6 = vrot.slane %v306_v3, %v312_v57  ;;  %v266_v7 = vpop.permute.xlu1 %265  ;;  %v264_v8 = vpop.permute.xlu0 %263 }
  0xa5   : > { %v297_v11 = vsel %vm289_vm2, %v251_v44, %v266_v7  ;;  %v295_v13 = vsel %vm289_vm2, %v249_v45, %v264_v8 }
  0xa6   : > { %v330_v14 = vcombine.low %v288_v10, %v297_v11  ;;  %v322_v4 = vcombine.low %v286_v12, %v295_v13  ;;  %v369_v16 = vcombine.low %v313_v6, %v321_v5 }
  0xa8   : > { %v337_v15 = vrot.slane %v330_v14, %v312_v57  ;;  %v329_v9 = vrot.slane %v322_v4, %v312_v57  ;;  %v377_v18 = vrot.slane %v369_v16, %v312_v57 }
  0xaa   : > { %v370_v17 = vcombine.low %v329_v9, %v337_v15 }
  0xac   : > { %v384_v19 = vrot.slane %v370_v17, %v312_v57 }
  0xae   : > { %v386_v20 = vcombine.high %v377_v18, %v384_v19  ;;  %v385_v21 = vcombine.low %v377_v18, %v384_v19 }
  0xb0   : > { %623 = vmatprep.mubr.msk.bf16.mxu0 %vm460_vm3, %v386_v20 }
  0xb1   : > { %497 = vmatmul.mubr.bf16.vlgmr.msra.gmra.mrb[0].mxu0 %v385_v21 }
 0x184   : > { %v498_v23 = vpop.f32.mrb[0].mxu0 }
 0x185   : > { %v499_v24 = vadd.f32 %v610_v22, %v498_v23  ;;  %v500_v25 = vpop.f32.mrb[1].mxu0 }
 0x186   : > { %v501_v26 = vpop.f32.mrb[2].mxu0 }
 0x187   : > { %505 = vst.msk [vmem:[%s177_s28] sm:$0xff] %vm267_vm0, %v499_v24  ;;  %v502_v27 = vadd.f32 %v610_v22, %v501_v26  ;;  %v503_v28 = vpop.f32.mrb[3].mxu0 }
 0x189   : > { %506 = vst.msk [vmem:[%s177_s28 + $0x8] sm:$0xff] %vm267_vm0, %v502_v27 }
 0x18a   : > { %723 = shalt.err (!%p720_p5)
}
 0x18b   : > { %s724_s11 = scalar_lea.hbm %s968_s6, 256  ;;  %s728_s21 = scalar_lea.hbm %s1021_s3, 512 }
 0x18c   : > { %p725_p6 = scmp.ne.s32.totalorder %s968_s6, %s724_s11  ;;  %p729_p10 = scmp.lt.u32.totalorder %s968_s6, %s1021_s3 }
 0x18d   : > { %p730_p11 = scmp.lt.u32.totalorder %s728_s21, %s724_s11  ;;  %p732_p13 = scmp.lt.u32.totalorder %s724_s11, %s968_s6 }
 0x18e   : > { %p726_p7 = pnand %p725_p6, %p858_p4 }
 0x18f   : > { %p731_p12 = por %p730_p11, %p729_p10 }
 0x190   : > { %p727_p9 = pneg %p726_p7 }
 0x191   : > { %p733_p0 = por %p732_p13, %p731_p12 }
 0x193   : > { %p734_p1 = pnand %p733_p0, %p727_p9 }
 0x195   : > { %737 = shalt.err (!%p734_p1)
}
 0x196   : > { %s796_s27 = smov 128   ;;  %s797_s28 = smov 8  }
 0x197   : > { %631 = dma.vmem_to_hbm [thread:$0]  (%p858_p4), %s963_s29, 256, %s968_s6, %s972_s15, %s796_s27, %s796_s27, %s797_s28  }
 0x198 PF: > { %p637_p2 = scmp.ge.s32.totalorder %s788_s17, 2  ;;  %s538_s30 = sand.u32 1, %s768_s12  }
 0x199   : > { %s539_s4 = scalar_lea.sflag [#allocation3], %s538_s30 }
 0x19a   : > { %p634_p3 = pnand %p637_p2, %p865_p8 }
 0x19c   : > { %763 = dma.done.wait (!%p634_p3), %s539_s4, 256  }
 0x19d   : > { %765 = vsyncadd (!%p634_p3), %s539_s4, 4294967040  ;;  %s16_s17 = sadd.s32 1, %s788_s17   ;;  %s1024_s12 = smov %s772_s13 }
 0x19e   : > { %p13_p5 = scmp.ge.s32.totalorder %s16_s17, 4   ;;  %s1025_s13 = smov %s776_s14 }
 0x19f   : > { %s1026_s14 = smov %s871_s25  ;;  %s1027_s15 = smov %s784_s16 }
 0x1a0   : > { %s1028_s16 = smov %s1030_s20  ;;  %15 = sbr.rel (!%p13_p5) target bundleno = 4 (0x4), region = 68 }
 0x1a7   :  { %544 = vsyncpa [#allocation3], 1 }
 0x1a8   :  { %546 = vsyncpa [#allocation3 + $0x1], 1 }

</bundles_post_ra>
